<compile_context>
chip_gen: v6e
topology: v6e:2x2x1
jax: 0.10.0
libtpu: 0.0.40
codegen_flags: <defaults>
</compile_context>

<pallas_src>
import functools

import jax
import jax.numpy as jnp
from jax.experimental import pallas as pl
from jax.experimental.pallas import tpu as pltpu


def _avg_pool_kernel(x_ref, w_ref, o_ref, *, kernel_size):
    # x_ref: (TR, L)  unpadded input rows
    # w_ref: (L, TC)  0/1 band matrix (padding already folded in)
    # o_ref: (TR, TC) pooled rows
    acc = jnp.dot(x_ref[...], w_ref[...], preferred_element_type=jnp.float32)
    o_ref[...] = (acc / jnp.float32(kernel_size)).astype(o_ref.dtype)


def _round_up(x, m):
    return ((x + m - 1) // m) * m


def _build_pool_weight(length, l_out, kernel_size, stride, padding, dtype):
    # W[l, j] = 1 iff unpadded position l lies in output window j, which covers
    # unpadded positions [j*stride - padding, j*stride - padding + K).
    # Positions falling in the zero padding contribute nothing to the sum;
    # dividing by K in the kernel reproduces count_include_pad=True.
    l_idx = jax.lax.broadcasted_iota(jnp.int32, (length, l_out), 0)
    j_idx = jax.lax.broadcasted_iota(jnp.int32, (length, l_out), 1)
    d = l_idx - (j_idx * stride - padding)
    in_window = jnp.logical_and(d >= 0, d < kernel_size)
    # 0/1 is exactly representable in bf16/f32, so the weight stays exact.
    return in_window.astype(dtype)


def _pick_col_tile(l_out, col_tile_max):
    # Full L_out as one block when small; otherwise a 128-aligned divisor.
    if l_out <= col_tile_max:
        return l_out
    for cand in (512, 384, 256, 128):
        if cand <= col_tile_max and l_out % cand == 0:
            return cand
    return l_out  # fall back to a single column block


def average_pool_1d(x, kernel_size, stride, padding=1, *,
                    row_tile=512, col_tile_max=512):
    """x: (N, C, L) float array. Returns (N, C, L_out), matching nn.AvgPool1d."""
    n, c, length = x.shape
    l_out = (length + 2 * padding - kernel_size) // stride + 1
    r = n * c

    rows = x.reshape(r, length)

    # Row tiling: tile size is a multiple of 8 sublanes; pad rows only if the
    # row count is not already a multiple of the tile (demo shapes need none).
    rt = min(row_tile, _round_up(r, 8))
    r_pad = _round_up(r, rt)
    if r_pad != r:
        rows = jnp.pad(rows, ((0, r_pad - r), (0, 0)))

    ct = _pick_col_tile(l_out, col_tile_max)

    w = _build_pool_weight(length, l_out, kernel_size, stride, padding, x.dtype)

    kernel = functools.partial(_avg_pool_kernel, kernel_size=kernel_size)
    itemsize = jnp.dtype(x.dtype).itemsize
    cost = pl.CostEstimate(
        flops=2 * r_pad * length * l_out,
        transcendentals=0,
        bytes_accessed=(r_pad * length + length * l_out + r_pad * l_out) * itemsize,
    )

    out_rows = pl.pallas_call(
        kernel,
        out_shape=jax.ShapeDtypeStruct((r_pad, l_out), x.dtype),
        grid_spec=pltpu.PrefetchScalarGridSpec(
            num_scalar_prefetch=0,
            grid=(r_pad // rt, l_out // ct),
            in_specs=[
                pl.BlockSpec((rt, length), lambda i, j: (i, 0)),
                pl.BlockSpec((length, ct), lambda i, j: (0, j)),
            ],
            out_specs=pl.BlockSpec((rt, ct), lambda i, j: (i, j)),
        ),
        compiler_params=pltpu.CompilerParams(
            dimension_semantics=("parallel", "parallel"),
        ),
        cost_estimate=cost,
    )(rows, w)

    return out_rows[:r].reshape(n, c, l_out)


class AveragePoolPallas:
    """Mirror of the PyTorch AveragePool module (no learned parameters)."""

    def __init__(self, lookup_kernel_size=3, lookup_stride=2):
        self.kernel_size = lookup_kernel_size
        self.stride = lookup_stride
        self.padding = 1

    def __call__(self, x):
        return average_pool_1d(
            x, kernel_size=self.kernel_size, stride=self.stride,
            padding=self.padding,
        )


if __name__ == "__main__":
    key = jax.random.PRNGKey(0)
    # Shapes consistent with AvgPool1d input: (batch=2, channels=4, seq_len=16)
    x = jax.random.normal(key, (2, 4, 16), dtype=jnp.float32)

    module = AveragePoolPallas(lookup_kernel_size=3, lookup_stride=2)
    out = module(x)
    out = jax.block_until_ready(out)

    # Pure-JAX reference (count_include_pad=True average pooling).
    pad = 1
    K, S = module.kernel_size, module.stride
    x_pad = jnp.pad(x, ((0, 0), (0, 0), (pad, pad)))
    l_out = (x.shape[-1] + 2 * pad - K) // S + 1
    ref = jnp.stack(
        [x_pad[..., j * S: j * S + K].sum(-1) / K for j in range(l_out)], axis=-1
    )
    assert out.shape == (2, 4, 8), out.shape
    assert jnp.allclose(out, ref, atol=1e-5, rtol=1e-5), float(
        jnp.max(jnp.abs(out - ref))
    )

    # Also check a bf16 path (native MXU dtype) stays within bf16 tolerance.
    xb = x.astype(jnp.bfloat16)
    out_b = jax.block_until_ready(module(xb))
    assert jnp.allclose(out_b.astype(jnp.float32), ref, atol=2e-2, rtol=2e-2)

    print("KERNEL_OK")
</pallas_src>

<mosaic_0001>
module attributes {stable_mosaic.version = 11 : i64} {
  func.func @_avg_pool_kernel(%arg0: i32, %arg1: i32, %arg2: memref<8x16xf32, #tpu.memory_space<vmem>>, %arg3: memref<16x8xf32, #tpu.memory_space<vmem>>, %arg4: memref<8x8xf32, #tpu.memory_space<vmem>>) attributes {dimension_semantics = [#tpu.dimension_semantics<parallel>, #tpu.dimension_semantics<parallel>], iteration_bounds = array<i64: 1, 1>, scalar_prefetch = 0 : i64, scratch_operands = 0 : i64, tpu.core_type = #tpu.core_type<tc>, window_params = [{transform_indices = @transform_0, window_bounds = array<i64: 8, 16>}, {transform_indices = @transform_1, window_bounds = array<i64: 16, 8>}, {transform_indices = @transform_2, window_bounds = array<i64: 8, 8>}]} {
    %c0 = arith.constant 0 : index
    %c0_0 = arith.constant 0 : index
    %0 = vector.load %arg2[%c0, %c0_0] : memref<8x16xf32, #tpu.memory_space<vmem>>, vector<8x16xf32>
    %c0_1 = arith.constant 0 : index
    %c0_2 = arith.constant 0 : index
    %1 = vector.load %arg3[%c0_1, %c0_2] : memref<16x8xf32, #tpu.memory_space<vmem>>, vector<16x8xf32>
    %cst = arith.constant dense<0.000000e+00> : vector<8x8xf32>
    %2 = tpu.matmul %0, %1, %cst {dimension_numbers = #tpu.dot_dimension_numbers<[1], [0], [0], [1], [0, 0, 1, 1], [], []>} : vector<8x16xf32>, vector<16x8xf32>, vector<8x8xf32> -> vector<8x8xf32>
    %cst_3 = arith.constant 3.000000e+00 : f32
    %3 = vector.broadcast %cst_3 : f32 to vector<8x8xf32>
    %4 = arith.divf %2, %3 : vector<8x8xf32>
    %c0_4 = arith.constant 0 : index
    %c0_5 = arith.constant 0 : index
    %5 = vector.load %arg4[%c0_4, %c0_5] : memref<8x8xf32, #tpu.memory_space<vmem>>, vector<8x8xf32>
    tpu.vector_store %arg4[%c0_4, %c0_5], %4 {strides = array<i32>} : memref<8x8xf32, #tpu.memory_space<vmem>>, vector<8x8xf32>,
    return
  }
  func.func @transform_0(%arg0: i32, %arg1: i32) -> (i32, i32) {
    %c0_i32 = arith.constant 0 : i32
    %c0_i32_0 = arith.constant 0 : i32
    return %arg0, %c0_i32 : i32, i32
  }
  func.func @transform_1(%arg0: i32, %arg1: i32) -> (i32, i32) {
    %c0_i32 = arith.constant 0 : i32
    %c0_i32_0 = arith.constant 0 : i32
    return %c0_i32, %arg1 : i32, i32
  }
  func.func @transform_2(%arg0: i32, %arg1: i32) -> (i32, i32) {
    %c0_i32 = arith.constant 0 : i32
    return %arg0, %arg1 : i32, i32
  }
}

</mosaic_0001>

<bundles_post_ra>
// kernel: tpu_custom_call.1
= control target key start
LH: loop header
LB: loop body
LE: loop exit
PB: predicated region body
PF: predicated region fallthrough
CT: control target
= control target key end

     0   :  { %v143_v1 = vmov 0.0   ;;  %vm144_vm0 = vmmov 0   ;;  %s173_s0 = inlined_call_operand.vmem [shape: f32[8,16], index: 0, kind: input, shape index: {}]   ;;  %s174_s1 = inlined_call_operand.vmem [shape: f32[16,8], index: 1, kind: input, shape index: {}]   ;;  %s175_s2 = inlined_call_operand.hbm [shape: f32[8,8], index: 2, kind: output, shape index: {}]  }
   0x1   :  { %v14_v0 = vld [vmem:[%s174_s1 + $0x8] sm:$0xff]  ;;  %111 = vmatprep.subr.mxu0 %v143_v1  ;;  %v13_v2 = vld [vmem:[%s174_s1] sm:$0xff]  ;;  %115 = vmatprep.mubr.msk.f32.mxu0 %vm144_vm0, %v143_v1 }
   0x2   :  { %7 = vsyncpa [#allocation3], 0  ;;  %112 = vmatpush3.msra.mxu0 %v14_v0  ;;  %v12_v3 = vld [vmem:[%s173_s0] sm:$0xff]  ;;  %vm15_vm1 = vcmask 130048   ;;  %s145_s15 = smov [#allocation2]   ;;  %vm91_vm2 = vcmask 64512  }
   0x3   :  { %113 = vmatprep.subr.mxu0 %v143_v1  ;;  %s99_s16 = sshll.u32 %s145_s15, 4  ;;  %s100_s16 = int_to_ptr.vmem [resolvable:$true] %s99_s16 }
   0x4   :  { %114 = vmatpush3.msra.mxu0 %v13_v2  ;;  %s121_s1 = scalar_lea.vmem %s100_s16, 128  ;;  %p126_p1 = scmp.lt.s32.totalorder %s100_s16, %s100_s16 }
   0x5   :  { %116 = vmatmul.mubr.msk.f32.vlgmr.msra.gmra.mxu0 %vm15_vm1, %v12_v3  ;;  %p122_p0 = scmp.ne.s32.totalorder %s100_s16, %s121_s1  ;;  %p127_p2 = scmp.lt.s32.totalorder %s121_s1, %s121_s1 }
   0x7   :  { %p128_p3 = por %p127_p2, %p126_p1 }
   0x9   :  { %p129_p4 = pnand %p128_p3, %p122_p0 }
  0xc5   :  { %v85_v4 = vpop.f32.mrf.mxu0 }
  0xc6   :  { %v90_v5 = vmul.f32 0.33333334, %v85_v4 }
  0xc7   :  { %v117_v6 = vpop.f32.mrf.mxu0 }
  0xc8   :  { %92 = vst.msk [vmem:[#allocation2] sm:$0xff] %vm91_vm2, %v90_v5 }
  0xc9   :  { %132 = shalt.err (!%p129_p4)
}
  0xca   :  { %102 = dma.vmem_to_hbm [thread:$0]  %s100_s16, 128, %s175_s2, [#allocation3]  }
  0xcb   :  { %141 = dma.done.wait [#allocation3], 128  }
  0xcc   :  { %142 = vsyncadd [#allocation3], 4294967168 }
  0xcd   :  { %106 = vsyncpa [#allocation3], 1 }

</bundles_post_ra>
